<compile_context>
chip_gen: v6e
topology: v6e:2x2x1
jax: 0.10.0
libtpu: 0.0.40
codegen_flags: <defaults>
</compile_context>

<pallas_src>
import functools

import numpy as np
import jax
import jax.numpy as jnp
from jax.experimental import pallas as pl
from jax.experimental.pallas import tpu as pltpu


# --------------------------------------------------------------------------
# numpy setup helpers (replicate the scipy/librosa pieces the module uses)
# --------------------------------------------------------------------------
def _hann_periodic(m):
    # scipy.signal.get_window('hann', m, fftbins=True)
    n = np.arange(m, dtype=np.float64)
    return 0.5 - 0.5 * np.cos(2.0 * np.pi * n / m)


def _pad_center(v, size):
    n = v.shape[0]
    lpad = (size - n) // 2
    return np.pad(v, (lpad, size - n - lpad))


def _window_sumsquare(n_frames, hop_length, win_length, n_fft):
    # librosa window_sumsquare for the 'hann' window, norm=None
    n = n_fft + hop_length * (n_frames - 1)
    x = np.zeros(n, dtype=np.float64)
    win_sq = _pad_center(_hann_periodic(win_length) ** 2, n_fft)
    for i in range(n_frames):
        s = i * hop_length
        x[s:min(n, s + n_fft)] += win_sq[:max(0, min(n_fft, n - s))]
    return x


def make_stft_basis(filter_length=800, hop_length=200, win_length=800):
    """Precompute forward/inverse bases in kernel-friendly fused layouts."""
    assert filter_length >= win_length
    assert filter_length % hop_length == 0, "hop_length must divide filter_length"
    assert (filter_length // 2) % hop_length == 0, "crop must be hop-aligned"
    scale = filter_length // hop_length
    cutoff = filter_length // 2 + 1
    H, C = hop_length, cutoff

    fourier = np.fft.fft(np.eye(filter_length))
    fb = np.vstack([np.real(fourier[:cutoff]), np.imag(fourier[:cutoff])])  # (2C, F)
    win = _pad_center(_hann_periodic(win_length), filter_length)
    fwd = fb * win[None, :]                                                  # forward_basis
    inv = np.linalg.pinv((filter_length / hop_length) * fb).T * win[None, :]  # inverse_basis

    # Fused real+imag layouts:
    #   w [j, r, c] = fwd[c, j*H + r]   forward, (scale, H, 2C)
    #   ib[j, c, r] = inv[c, j*H + r]   inverse, (scale, 2C, H)
    w = fwd.T.reshape(scale, H, 2 * C)
    ib = inv.reshape(2 * C, scale, H).transpose(1, 0, 2)

    return dict(filter_length=filter_length, hop_length=hop_length,
                win_length=win_length, scale=scale, cutoff=cutoff,
                w=jnp.asarray(w, jnp.float32), ib=jnp.asarray(ib, jnp.float32))


# --------------------------------------------------------------------------
# Fused STFT round-trip kernel: one batch element per grid step.
# --------------------------------------------------------------------------
def _stft_roundtrip_kernel(y_ref, w_ref, ib_ref, corr_ref, o_ref, acc_ref,
                           *, n_frames, scale, half_chunks):
    # y_ref:   (1, n_chunks, hop)  reflect-padded signal, hop-sized rows
    # w_ref:   (scale, hop, 2*cutoff)   forward basis (real & imag fused)
    # ib_ref:  (scale, 2*cutoff, hop)   inverse basis (real & imag fused)
    # corr:    (out_chunks, hop)        cropped (F/hop)/window_sumsquare factor
    # o_ref:   (1, out_chunks, hop)
    # acc_ref: (n_chunks, hop) VMEM scratch (overlap-add accumulator)
    y = y_ref[0]
    hop = acc_ref.shape[1]
    two_c = w_ref.shape[2]

    # ---- transform: hop-strided windowed-DFT conv as `scale` sublane-shifted
    #      matmuls (contraction depth = hop), real/imag fused in one N dim ----
    spec = jnp.zeros((n_frames, two_c), jnp.float32)
    for j in range(scale):                       # scale = filter_length//hop (4) -> unrolled
        blk = y[j:j + n_frames, :]               # frame f, taps [j*hop, (j+1)*hop)
        spec = spec + jnp.dot(blk, w_ref[j], preferred_element_type=jnp.float32)

    # magnitude*cos(phase) == real and magnitude*sin(phase) == imag exactly,
    # so the recombined tensor fed to the inverse transform is `spec` itself.
    # TODO(synk): phase (atan2) / magnitude (sqrt) are not materialized; they
    # are stored torch attributes only and are not needed for forward()'s
    # returned reconstruction.

    # ---- inverse: ConvTranspose1d(stride=hop) as `scale` matmuls + overlap-add
    for j in range(scale):
        zj = jnp.dot(spec, ib_ref[j], preferred_element_type=jnp.float32)  # (n_frames, hop)
        if j == 0:
            # initialize accumulator with the first contribution (no zero pass)
            acc_ref[0:n_frames, :] = zj
            if scale > 1:
                acc_ref[n_frames:n_frames + scale - 1, :] = jnp.zeros(
                    (scale - 1, hop), jnp.float32)
        else:
            acc_ref[j:j + n_frames, :] = acc_ref[j:j + n_frames, :] + zj

    # ---- window-sumsquare correction + center crop, single output store ----
    out_chunks = o_ref.shape[1]
    o_ref[0] = acc_ref[half_chunks:half_chunks + out_chunks, :] * corr_ref[...]


def stft_forward(x, basis):
    """STFT.forward: x (B, num_samples) -> reconstruction (B, 1, num_samples)."""
    B, num_samples = x.shape
    F = basis['filter_length']
    H = basis['hop_length']
    scale = basis['scale']
    cutoff = basis['cutoff']
    assert num_samples % H == 0, "num_samples must be a multiple of hop_length"
    assert num_samples > F // 2, "signal too short for reflect padding"

    # reflect padding: only a tiny F-sample halo per row (no full-size HBM copy
    # of a conv-padded activation; stride/framing is handled inside the kernel)
    x_pad = jnp.pad(x, ((0, 0), (F // 2, F // 2)), mode='reflect')
    n_chunks = (num_samples + F) // H
    n_frames = num_samples // H + 1
    out_chunks = num_samples // H
    half_chunks = (F // 2) // H
    y = x_pad.reshape(B, n_chunks, H)

    # (F/hop) / window_sumsquare, already cropped; constant folded at trace time
    wsum = _window_sumsquare(n_frames, H, basis['win_length'], F)
    tiny = np.finfo(np.float32).tiny
    corr = np.where(wsum > tiny, 1.0 / np.maximum(wsum, tiny), 1.0) * (F / H)
    corr = jnp.asarray(corr[F // 2:F // 2 + num_samples].reshape(out_chunks, H),
                       jnp.float32)

    kern = functools.partial(_stft_roundtrip_kernel, n_frames=n_frames,
                             scale=scale, half_chunks=half_chunks)
    rec = pl.pallas_call(
        kern,
        out_shape=jax.ShapeDtypeStruct((B, out_chunks, H), jnp.float32),
        grid=(B,),
        in_specs=[
            pl.BlockSpec((1, n_chunks, H), lambda b: (b, 0, 0)),
            pl.BlockSpec((scale, H, 2 * cutoff), lambda b: (0, 0, 0)),
            pl.BlockSpec((scale, 2 * cutoff, H), lambda b: (0, 0, 0)),
            pl.BlockSpec((out_chunks, H), lambda b: (0, 0)),
        ],
        out_specs=pl.BlockSpec((1, out_chunks, H), lambda b: (b, 0, 0)),
        scratch_shapes=[pltpu.VMEM((n_chunks, H), jnp.float32)],
        compiler_params=pltpu.CompilerParams(dimension_semantics=("parallel",)),
    )(y, basis['w'], basis['ib'], corr)

    return rec.reshape(B, 1, num_samples)


if __name__ == "__main__":
    key = jax.random.PRNGKey(0)

    # --- small shapes with the same structure as the defaults (800, 200, 800)
    B, num_samples = 2, 64
    filter_length, hop_length, win_length = 16, 4, 16

    basis = make_stft_basis(filter_length, hop_length, win_length)
    x = jax.random.normal(key, (B, num_samples), jnp.float32)

    rec = stft_forward(x, basis)
    rec = jax.block_until_ready(rec)

    assert rec.shape == (B, 1, num_samples), rec.shape
    assert bool(jnp.all(jnp.isfinite(rec)))
    # hann @ 75% overlap with the window-sumsquare correction reconstructs the
    # input exactly (up to f32 rounding) -- sanity-check the round trip.
    err = float(jnp.max(jnp.abs(rec[:, 0, :] - x)))
    assert err < 1e-3, err

    # --- default module geometry (800/200/800) at a short length: verifies the
    # real configuration (cutoff=401, hop=200) compiles and reconstructs.
    basis_d = make_stft_basis(800, 200, 800)
    x_d = jax.random.normal(jax.random.PRNGKey(0), (1, 2400), jnp.float32)
    rec_d = jax.block_until_ready(stft_forward(x_d, basis_d))
    assert rec_d.shape == (1, 1, 2400), rec_d.shape
    assert bool(jnp.all(jnp.isfinite(rec_d)))
    err_d = float(jnp.max(jnp.abs(rec_d[:, 0, :] - x_d)))
    assert err_d < 1e-2, err_d

    print("KERNEL_OK")
</pallas_src>

<mosaic_0001>
module attributes {stable_mosaic.version = 11 : i64} {
  func.func @_stft_roundtrip_kernel(%arg0: i32, %arg1: memref<1x20x4xf32, #tpu.memory_space<vmem>>, %arg2: memref<4x4x18xf32, #tpu.memory_space<vmem>>, %arg3: memref<4x18x4xf32, #tpu.memory_space<vmem>>, %arg4: memref<16x4xf32, #tpu.memory_space<vmem>>, %arg5: memref<1x16x4xf32, #tpu.memory_space<vmem>>, %arg6: memref<20x4xf32, #tpu.memory_space<vmem>>) attributes {dimension_semantics = [#tpu.dimension_semantics<parallel>], iteration_bounds = array<i64: 2>, scalar_prefetch = 0 : i64, scratch_operands = 1 : i64, tpu.core_type = #tpu.core_type<tc>, window_params = [{transform_indices = @transform_0, window_bounds = array<i64: 1, 20, 4>}, {pipeline_mode = #tpu.pipeline_mode<synchronous>, transform_indices = @transform_1, window_bounds = array<i64: 4, 4, 18>}, {pipeline_mode = #tpu.pipeline_mode<synchronous>, transform_indices = @transform_2, window_bounds = array<i64: 4, 18, 4>}, {pipeline_mode = #tpu.pipeline_mode<synchronous>, transform_indices = @transform_3, window_bounds = array<i64: 16, 4>}, {transform_indices = @transform_4, window_bounds = array<i64: 1, 16, 4>}]} {
    %c0 = arith.constant 0 : index
    %c0_0 = arith.constant 0 : index
    %c0_1 = arith.constant 0 : index
    %0 = vector.load %arg1[%c0, %c0_0, %c0_1] : memref<1x20x4xf32, #tpu.memory_space<vmem>>, vector<1x20x4xf32>
    %1 = vector.shape_cast %0 : vector<1x20x4xf32> to vector<20x4xf32>
    %cst = arith.constant 0.000000e+00 : f32
    %2 = vector.broadcast %cst : f32 to vector<17x18xf32>
    %3 = vector.extract_strided_slice %1 {offsets = [0, 0], sizes = [17, 4], strides = [1, 1]} : vector<20x4xf32> to vector<17x4xf32>
    %c0_2 = arith.constant 0 : index
    %c0_3 = arith.constant 0 : index
    %c0_4 = arith.constant 0 : index
    %4 = vector.load %arg2[%c0_2, %c0_3, %c0_4] : memref<4x4x18xf32, #tpu.memory_space<vmem>>, vector<1x4x18xf32>
    %5 = vector.shape_cast %4 : vector<1x4x18xf32> to vector<4x18xf32>
    %cst_5 = arith.constant dense<0.000000e+00> : vector<17x18xf32>
    %6 = tpu.matmul %3, %5, %cst_5 {dimension_numbers = #tpu.dot_dimension_numbers<[1], [0], [0], [1], [0, 0, 1, 1], [], []>} : vector<17x4xf32>, vector<4x18xf32>, vector<17x18xf32> -> vector<17x18xf32>
    %7 = arith.addf %2, %6 : vector<17x18xf32>
    %8 = vector.extract_strided_slice %1 {offsets = [1, 0], sizes = [17, 4], strides = [1, 1]} : vector<20x4xf32> to vector<17x4xf32>
    %c1 = arith.constant 1 : index
    %c0_6 = arith.constant 0 : index
    %c0_7 = arith.constant 0 : index
    %9 = vector.load %arg2[%c1, %c0_6, %c0_7] : memref<4x4x18xf32, #tpu.memory_space<vmem>>, vector<1x4x18xf32>
    %10 = vector.shape_cast %9 : vector<1x4x18xf32> to vector<4x18xf32>
    %cst_8 = arith.constant dense<0.000000e+00> : vector<17x18xf32>
    %11 = tpu.matmul %8, %10, %cst_8 {dimension_numbers = #tpu.dot_dimension_numbers<[1], [0], [0], [1], [0, 0, 1, 1], [], []>} : vector<17x4xf32>, vector<4x18xf32>, vector<17x18xf32> -> vector<17x18xf32>
    %12 = arith.addf %7, %11 : vector<17x18xf32>
    %13 = vector.extract_strided_slice %1 {offsets = [2, 0], sizes = [17, 4], strides = [1, 1]} : vector<20x4xf32> to vector<17x4xf32>
    %c2 = arith.constant 2 : index
    %c0_9 = arith.constant 0 : index
    %c0_10 = arith.constant 0 : index
    %14 = vector.load %arg2[%c2, %c0_9, %c0_10] : memref<4x4x18xf32, #tpu.memory_space<vmem>>, vector<1x4x18xf32>
    %15 = vector.shape_cast %14 : vector<1x4x18xf32> to vector<4x18xf32>
    %cst_11 = arith.constant dense<0.000000e+00> : vector<17x18xf32>
    %16 = tpu.matmul %13, %15, %cst_11 {dimension_numbers = #tpu.dot_dimension_numbers<[1], [0], [0], [1], [0, 0, 1, 1], [], []>} : vector<17x4xf32>, vector<4x18xf32>, vector<17x18xf32> -> vector<17x18xf32>
    %17 = arith.addf %12, %16 : vector<17x18xf32>
    %18 = vector.extract_strided_slice %1 {offsets = [3, 0], sizes = [17, 4], strides = [1, 1]} : vector<20x4xf32> to vector<17x4xf32>
    %c3 = arith.constant 3 : index
    %c0_12 = arith.constant 0 : index
    %c0_13 = arith.constant 0 : index
    %19 = vector.load %arg2[%c3, %c0_12, %c0_13] : memref<4x4x18xf32, #tpu.memory_space<vmem>>, vector<1x4x18xf32>
    %20 = vector.shape_cast %19 : vector<1x4x18xf32> to vector<4x18xf32>
    %cst_14 = arith.constant dense<0.000000e+00> : vector<17x18xf32>
    %21 = tpu.matmul %18, %20, %cst_14 {dimension_numbers = #tpu.dot_dimension_numbers<[1], [0], [0], [1], [0, 0, 1, 1], [], []>} : vector<17x4xf32>, vector<4x18xf32>, vector<17x18xf32> -> vector<17x18xf32>
    %22 = arith.addf %17, %21 : vector<17x18xf32>
    %c0_15 = arith.constant 0 : index
    %c0_16 = arith.constant 0 : index
    %c0_17 = arith.constant 0 : index
    %23 = vector.load %arg3[%c0_15, %c0_16, %c0_17] : memref<4x18x4xf32, #tpu.memory_space<vmem>>, vector<1x18x4xf32>
    %24 = vector.shape_cast %23 : vector<1x18x4xf32> to vector<18x4xf32>
    %cst_18 = arith.constant dense<0.000000e+00> : vector<17x4xf32>
    %25 = tpu.matmul %22, %24, %cst_18 {dimension_numbers = #tpu.dot_dimension_numbers<[1], [0], [0], [1], [0, 0, 1, 1], [], []>} : vector<17x18xf32>, vector<18x4xf32>, vector<17x4xf32> -> vector<17x4xf32>
    %c0_19 = arith.constant 0 : index
    %c0_20 = arith.constant 0 : index
    %26 = vector.load %arg6[%c0_19, %c0_20] : memref<20x4xf32, #tpu.memory_space<vmem>>, vector<17x4xf32>
    tpu.vector_store %arg6[%c0_19, %c0_20], %25 {strides = array<i32>} : memref<20x4xf32, #tpu.memory_space<vmem>>, vector<17x4xf32>,
    %cst_21 = arith.constant 0.000000e+00 : f32
    %27 = vector.broadcast %cst_21 : f32 to vector<3x4xf32>
    %c17 = arith.constant 17 : index
    %c0_22 = arith.constant 0 : index
    %28 = vector.load %arg6[%c17, %c0_22] : memref<20x4xf32, #tpu.memory_space<vmem>>, vector<3x4xf32>
    tpu.vector_store %arg6[%c17, %c0_22], %27 {strides = array<i32>} : memref<20x4xf32, #tpu.memory_space<vmem>>, vector<3x4xf32>,
    %c1_23 = arith.constant 1 : index
    %c0_24 = arith.constant 0 : index
    %c0_25 = arith.constant 0 : index
    %29 = vector.load %arg3[%c1_23, %c0_24, %c0_25] : memref<4x18x4xf32, #tpu.memory_space<vmem>>, vector<1x18x4xf32>
    %30 = vector.shape_cast %29 : vector<1x18x4xf32> to vector<18x4xf32>
    %cst_26 = arith.constant dense<0.000000e+00> : vector<17x4xf32>
    %31 = tpu.matmul %22, %30, %cst_26 {dimension_numbers = #tpu.dot_dimension_numbers<[1], [0], [0], [1], [0, 0, 1, 1], [], []>} : vector<17x18xf32>, vector<18x4xf32>, vector<17x4xf32> -> vector<17x4xf32>
    %c1_27 = arith.constant 1 : index
    %c0_28 = arith.constant 0 : index
    %32 = vector.load %arg6[%c1_27, %c0_28] : memref<20x4xf32, #tpu.memory_space<vmem>>, vector<17x4xf32>
    %33 = arith.addf %32, %31 : vector<17x4xf32>
    %c1_29 = arith.constant 1 : index
    %c0_30 = arith.constant 0 : index
    %34 = vector.load %arg6[%c1_29, %c0_30] : memref<20x4xf32, #tpu.memory_space<vmem>>, vector<17x4xf32>
    tpu.vector_store %arg6[%c1_29, %c0_30], %33 {strides = array<i32>} : memref<20x4xf32, #tpu.memory_space<vmem>>, vector<17x4xf32>,
    %c2_31 = arith.constant 2 : index
    %c0_32 = arith.constant 0 : index
    %c0_33 = arith.constant 0 : index
    %35 = vector.load %arg3[%c2_31, %c0_32, %c0_33] : memref<4x18x4xf32, #tpu.memory_space<vmem>>, vector<1x18x4xf32>
    %36 = vector.shape_cast %35 : vector<1x18x4xf32> to vector<18x4xf32>
    %cst_34 = arith.constant dense<0.000000e+00> : vector<17x4xf32>
    %37 = tpu.matmul %22, %36, %cst_34 {dimension_numbers = #tpu.dot_dimension_numbers<[1], [0], [0], [1], [0, 0, 1, 1], [], []>} : vector<17x18xf32>, vector<18x4xf32>, vector<17x4xf32> -> vector<17x4xf32>
    %c2_35 = arith.constant 2 : index
    %c0_36 = arith.constant 0 : index
    %38 = vector.load %arg6[%c2_35, %c0_36] : memref<20x4xf32, #tpu.memory_space<vmem>>, vector<17x4xf32>
    %39 = arith.addf %38, %37 : vector<17x4xf32>
    %c2_37 = arith.constant 2 : index
    %c0_38 = arith.constant 0 : index
    %40 = vector.load %arg6[%c2_37, %c0_38] : memref<20x4xf32, #tpu.memory_space<vmem>>, vector<17x4xf32>
    tpu.vector_store %arg6[%c2_37, %c0_38], %39 {strides = array<i32>} : memref<20x4xf32, #tpu.memory_space<vmem>>, vector<17x4xf32>,
    %c3_39 = arith.constant 3 : index
    %c0_40 = arith.constant 0 : index
    %c0_41 = arith.constant 0 : index
    %41 = vector.load %arg3[%c3_39, %c0_40, %c0_41] : memref<4x18x4xf32, #tpu.memory_space<vmem>>, vector<1x18x4xf32>
    %42 = vector.shape_cast %41 : vector<1x18x4xf32> to vector<18x4xf32>
    %cst_42 = arith.constant dense<0.000000e+00> : vector<17x4xf32>
    %43 = tpu.matmul %22, %42, %cst_42 {dimension_numbers = #tpu.dot_dimension_numbers<[1], [0], [0], [1], [0, 0, 1, 1], [], []>} : vector<17x18xf32>, vector<18x4xf32>, vector<17x4xf32> -> vector<17x4xf32>
    %c3_43 = arith.constant 3 : index
    %c0_44 = arith.constant 0 : index
    %44 = vector.load %arg6[%c3_43, %c0_44] : memref<20x4xf32, #tpu.memory_space<vmem>>, vector<17x4xf32>
    %45 = arith.addf %44, %43 : vector<17x4xf32>
    %c3_45 = arith.constant 3 : index
    %c0_46 = arith.constant 0 : index
    %46 = vector.load %arg6[%c3_45, %c0_46] : memref<20x4xf32, #tpu.memory_space<vmem>>, vector<17x4xf32>
    tpu.vector_store %arg6[%c3_45, %c0_46], %45 {strides = array<i32>} : memref<20x4xf32, #tpu.memory_space<vmem>>, vector<17x4xf32>,
    %c2_47 = arith.constant 2 : index
    %c0_48 = arith.constant 0 : index
    %47 = vector.load %arg6[%c2_47, %c0_48] : memref<20x4xf32, #tpu.memory_space<vmem>>, vector<16x4xf32>
    %c0_49 = arith.constant 0 : index
    %c0_50 = arith.constant 0 : index
    %48 = vector.load %arg4[%c0_49, %c0_50] : memref<16x4xf32, #tpu.memory_space<vmem>>, vector<16x4xf32>
    %49 = arith.mulf %47, %48 : vector<16x4xf32>
    %c0_51 = arith.constant 0 : index
    %c0_52 = arith.constant 0 : index
    %c0_53 = arith.constant 0 : index
    %50 = vector.load %arg5[%c0_51, %c0_52, %c0_53] : memref<1x16x4xf32, #tpu.memory_space<vmem>>, vector<1x16x4xf32>
    %51 = vector.shape_cast %50 : vector<1x16x4xf32> to vector<16x4xf32>
    %52 = vector.shape_cast %49 : vector<16x4xf32> to vector<1x16x4xf32>
    tpu.vector_store %arg5[%c0_51, %c0_52, %c0_53], %52 {strides = array<i32>} : memref<1x16x4xf32, #tpu.memory_space<vmem>>, vector<1x16x4xf32>,
    return
  }
  func.func @transform_0(%arg0: i32) -> (i32, i32, i32) {
    %c0_i32 = arith.constant 0 : i32
    %c0_i32_0 = arith.constant 0 : i32
    %c0_i32_1 = arith.constant 0 : i32
    return %arg0, %c0_i32, %c0_i32_0 : i32, i32, i32
  }
  func.func @transform_1(%arg0: i32) -> (i32, i32, i32) {
    %c0_i32 = arith.constant 0 : i32
    %c0_i32_0 = arith.constant 0 : i32
    %c0_i32_1 = arith.constant 0 : i32
    %c0_i32_2 = arith.constant 0 : i32
    return %c0_i32, %c0_i32_0, %c0_i32_1 : i32, i32, i32
  }
  func.func @transform_2(%arg0: i32) -> (i32, i32, i32) {
    %c0_i32 = arith.constant 0 : i32
    %c0_i32_0 = arith.constant 0 : i32
    %c0_i32_1 = arith.constant 0 : i32
    %c0_i32_2 = arith.constant 0 : i32
    return %c0_i32, %c0_i32_0, %c0_i32_1 : i32, i32, i32
  }
  func.func @transform_3(%arg0: i32) -> (i32, i32) {
    %c0_i32 = arith.constant 0 : i32
    %c0_i32_0 = arith.constant 0 : i32
    %c0_i32_1 = arith.constant 0 : i32
    return %c0_i32, %c0_i32_0 : i32, i32
  }
  func.func @transform_4(%arg0: i32) -> (i32, i32, i32) {
    %c0_i32 = arith.constant 0 : i32
    %c0_i32_0 = arith.constant 0 : i32
    %c0_i32_1 = arith.constant 0 : i32
    return %arg0, %c0_i32, %c0_i32_0 : i32, i32, i32
  }
}

</mosaic_0001>

<bundles_post_ra>
// kernel: tpu_custom_call.1
= control target key start
LH: loop header
LB: loop body
LE: loop exit
PB: predicated region body
PF: predicated region fallthrough
CT: control target
= control target key end

     0   :  { %s1292_s15 = smov 0   ;;  %s1478_s0 = inlined_call_operand.vmem [shape: f32[2,20,4], index: 0, kind: input, shape index: {}]   ;;  %s1479_s1 = inlined_call_operand.vmem [shape: f32[4,4,18], index: 1, kind: input, shape index: {}]   ;;  %s1480_s2 = inlined_call_operand.vmem [shape: f32[4,18,4], index: 2, kind: input, shape index: {}]   ;;  %s1481_s3 = inlined_call_operand.vmem [shape: f32[16,4], index: 3, kind: input, shape index: {}]   ;;  %s1482_s4 = inlined_call_operand.vmem [shape: f32[2,16,4], index: 4, kind: output, shape index: {}]  }
   0x1 LB: > { %s1047_s16 = sadd.s32 4294967295, %s1263_s15   ;;  %p1051_p0 = scmp.ge.s32.totalorder %s1263_s15, 1  ;;  %s1263_s15 = sphi %s1292_s15, %s14_s15  }
   0x2   : > { %p162_p1 = scmp.lt.s32.totalorder %s1263_s15, 3 }
   0x4   : > { %p163_p2 = pnand %p1051_p0, %p162_p1 }
   0x5   : > { %p188_p3 = scmp.lt.s32.totalorder (!%p163_p2), %s1047_s16, 1 }
   0x6   : > { %166 = sbr.rel (%p163_p2) target bundleno = 471 (0x1d7), region = 36 }
   0xb   : > { %v1055_v0 = vld [vmem:[%s1479_s1 + $0x4] sm:$0xf]  ;;  %vm220_vm0 = vcmask 1043456   ;;  %v1265_v1 = vmov 0.0   ;;  %v201_v2 = vld [vmem:[%s1479_s1] sm:$0xf] }
   0xc   : > { %1142 = vmatprep.subr.mxu0 %v1265_v1  ;;  %1153 = vmatprep.subr.mxu1 %v1265_v1  ;;  %vm1266_vm1 = vmmov 0   ;;  %s1484_s16 = smov (!%p188_p3, %s1047_s16), 1  ;;  %vm213_vm2 = vcmask 31744   ;;  %v1069_v3 = vld [vmem:[%s1479_s1 + $0xc] sm:$0xf]  ;;  %vm207_vm3 = vcmask 1046528  }
   0xd   : > { %1143 = vmatpush3.msk.msra.mxu0 %vm220_vm0, %v1055_v0  ;;  %1144 = vmatprep.mubr.msk.f32.mxu0 %vm1266_vm1, %v1265_v1  ;;  %s1246_s21 = smul.u32 24, %s1484_s16  ;;  %v1064_v10 = vld [vmem:[%s1479_s1 + $0x8] sm:$0xf]  ;;  %vm495_vm4 = vcmask 1044480   ;;  %vm395_vm5 = vcmask 1045504   ;;  %vm606_vm6 = vcmask 1041408  }
   0xe   : > { %1154 = vmatpush3.msk.msra.mxu1 %vm220_vm0, %v201_v2  ;;  %1155 = vmatprep.mubr.msk.f32.mxu1 %vm1266_vm1, %v1265_v1  ;;  %v595_v23 = vld [vmem:[%s1480_s2 + $0x10] sm:$0x3]  ;;  %v594_v24 = vld [vmem:[%s1480_s2 + $0x8] sm:$0xff]  ;;  %v1079_v26 = vld [vmem:[%s1480_s2 + $0x20] sm:$0xff]  ;;  %vm596_vm7 = vcmask 146432   ;;  %vm694_vm8 = vcmask 26624  }
   0xf   : > { %1164 = vmatprep.subr.mxu0 %v1265_v1  ;;  %1175 = vmatprep.subr.mxu1 %v1265_v1  ;;  %s192_s24 = scalar_lea.vmem %s1478_s0, %s1246_s21  ;;  %v1080_v25 = vld [vmem:[%s1480_s2 + $0x28] sm:$0x3]  ;;  %v593_v27 = vld [vmem:[%s1480_s2] sm:$0xff]  ;;  %v1078_v28 = vld [vmem:[%s1480_s2 + $0x18] sm:$0xff]  ;;  %695 = vst.msk [vmem:[#allocation2 + $0x11] sm:$0x7] %vm694_vm8, %v1265_v1 }
  0x10   : > { %v198_v4 = vld [vmem:[%s192_s24] sm:$0xff]  ;;  %v199_v5 = vld [vmem:[%s192_s24 + $0x8] sm:$0xff]  ;;  %v200_v6 = vld [vmem:[%s192_s24 + $0x10] sm:$0xf]  ;;  %vm692_vm9 = vcmask 24576   ;;  %s1101_s29 = sshll.u32 %s1484_s16, 4 }
  0x11   : > { %v208_v7 = vrot.slane %v198_v4, 1  ;;  %v209_v8 = vrot.slane %v199_v5, 1  ;;  %1156 = vmatmul.mubr.msk.f32.vlgmr.msra.gmra.mxu1 %vm213_vm2, %v198_v4  ;;  %v211_v9 = vrot.slane %v200_v6, 1  ;;  %v496_v13 = vrot.slane %v198_v4, 3  ;;  %v1087_v52 = vld [vmem:[%s1480_s2 + $0x40] sm:$0x3]  ;;  %s197_s10 = scalar_lea.vmem %s1482_s4, %s1101_s29 }
  0x12   : > { %1176 = vmatpush3.msk.msra.mxu1 %vm220_vm0, %v1069_v3  ;;  %1158 = vmatprep.mubr.msk.f32.mxu1 %vm1266_vm1, %v1265_v1  ;;  %v497_v14 = vrot.slane %v199_v5, 3  ;;  %v396_v15 = vrot.slane %v198_v4, 2  ;;  %v397_v16 = vrot.slane %v199_v5, 2  ;;  %v499_v18 = vrot.slane %v200_v6, 3  ;;  %v1094_v53 = vld [vmem:[%s1480_s2 + $0x58] sm:$0x3] }
  0x13   : > { %v210_v11 = vsel %vm207_vm3, %v208_v7, %v209_v8  ;;  %1201 = vmatprep.subr.mxu1 %v1265_v1  ;;  %v212_v12 = vsel %vm207_vm3, %v209_v8, %v211_v9  ;;  %v399_v20 = vrot.slane %v200_v6, 2  ;;  %v1086_v61 = vld [vmem:[%s1480_s2 + $0x38] sm:$0xff]  ;;  %v1093_v62 = vld [vmem:[%s1480_s2 + $0x50] sm:$0xff]  ;;  %v1092_v4 = vld [vmem:[%s1480_s2 + $0x48] sm:$0xff] }
  0x14   : > { %1145 = vmatmul.mubr.msk.f32.vlgmr.msra.gmra.mxu0 %vm213_vm2, %v210_v11  ;;  %v498_v17 = vsel %vm495_vm4, %v496_v13, %v497_v14  ;;  %v398_v19 = vsel %vm395_vm5, %v396_v15, %v397_v16  ;;  %v500_v21 = vsel %vm495_vm4, %v497_v14, %v499_v18  ;;  %v1085_v3 = vld [vmem:[%s1480_s2 + $0x30] sm:$0xff] }
  0x15   : > { %1165 = vmatpush3.msk.msra.mxu0 %vm220_vm0, %v1064_v10  ;;  %1147 = vmatprep.mubr.msk.f32.mxu0 %vm1266_vm1, %v1265_v1  ;;  %v400_v22 = vsel %vm395_vm5, %v397_v16, %v399_v20 }
  0x16   : > { %1159 = vmatmul.mubr.msk.f32.gmra.mxu1 %vm213_vm2, %v199_v5  ;;  %1186 = vmatprep.subr.mxu0 %v1265_v1  ;;  %v785_v13 = vld [vmem:[#allocation2 + $0x11] sm:$0x1] }
  0x17   : > { %1161 = vmatprep.mubr.msk.f32.mxu1 %vm1266_vm1, %v1265_v1 }
  0x18   : > { %1148 = vmatmul.mubr.msk.f32.gmra.mxu0 %vm213_vm2, %v212_v12 }
  0x19   : > { %1150 = vmatprep.mubr.msk.f32.mxu0 %vm1266_vm1, %v1265_v1 }
  0x1a   : > { %1162 = vmatmul.mubr.msk.f32.gmra.mxu1 %vm213_vm2, %v200_v6 }
  0x1b   : > { %1177 = vmatprep.mubr.msk.f32.mxu1 %vm1266_vm1, %v1265_v1 }
  0x1c   : > { %1151 = vmatmul.mubr.msk.f32.gmra.mxu0 %vm213_vm2, %v211_v9 }
  0x1d   : > { %1166 = vmatprep.mubr.msk.f32.mxu0 %vm1266_vm1, %v1265_v1 }
  0x1e   : > { %1178 = vmatmul.mubr.msk.f32.vlgmr.msra.gmra.mxu1 %vm213_vm2, %v498_v17 }
  0x1f   : > { %1180 = vmatprep.mubr.msk.f32.mxu1 %vm1266_vm1, %v1265_v1  ;;  %1202 = vmatpush3.msk.msra.mxu1 %vm606_vm6, %v1080_v25 }
  0x20   : > { %1167 = vmatmul.mubr.msk.f32.vlgmr.msra.gmra.mxu0 %vm213_vm2, %v398_v19  ;;  %1203 = vmatprep.subr.mxu1 %v1265_v1 }
  0x21   : > { %1169 = vmatprep.mubr.msk.f32.mxu0 %vm1266_vm1, %v1265_v1  ;;  %1187 = vmatpush3.msk.msra.mxu0 %vm606_vm6, %v595_v23 }
  0x22   : > { %1181 = vmatmul.mubr.msk.f32.gmra.mxu1 %vm213_vm2, %v500_v21  ;;  %1188 = vmatprep.subr.mxu0 %v1265_v1 }
  0x23   : > { %1183 = vmatprep.mubr.msk.f32.mxu1 %vm1266_vm1, %v1265_v1  ;;  %1189 = vmatpush3.msra.mxu0 %v594_v24 }
  0x24   : > { %1170 = vmatmul.mubr.msk.f32.gmra.mxu0 %vm213_vm2, %v400_v22  ;;  %1190 = vmatprep.subr.mxu0 %v1265_v1 }
  0x25   : > { %1172 = vmatprep.mubr.msk.f32.mxu0 %vm1266_vm1, %v1265_v1  ;;  %1204 = vmatpush3.msra.mxu1 %v1079_v26 }
  0x26   : > { %1184 = vmatmul.mubr.msk.f32.gmra.mxu1 %vm213_vm2, %v499_v18  ;;  %1205 = vmatprep.subr.mxu1 %v1265_v1 }
  0x27   : > { %1207 = vmatprep.mubr.msk.f32.mxu1 %vm1266_vm1, %v1265_v1  ;;  %1191 = vmatpush3.msra.mxu0 %v593_v27 }
  0x28   : > { %1173 = vmatmul.mubr.msk.f32.gmra.mxu0 %vm213_vm2, %v399_v20  ;;  %1206 = vmatpush3.msra.mxu1 %v1078_v28 }
  0x29   : > { %1192 = vmatprep.mubr.msk.f32.mxu0 %vm1266_vm1, %v1265_v1  ;;  %1216 = vmatprep.subr.mxu0 %v1265_v1 }
  0x2a   : > { %1231 = vmatprep.subr.mxu1 %v1265_v1 }
  0xd1   : > { %v379_v29 = vpop.f32.mrf.mxu1 }
  0xd3   : > { %v1157_v30 = vpop.f32.mrf.mxu1 }
  0xd4   : > { %v290_v31 = vpop.f32.mrf.mxu0  ;;  %v881_v30 = vld [vmem:[#allocation2 + $0x12] sm:$0x1] }
  0xd5   : > { %v380_v42 = vadd.f32 %v379_v29, %v290_v31  ;;  %v977_v31 = vld [vmem:[#allocation2 + $0x13] sm:$0x1] }
  0xd6   : > { %v1146_v32 = vpop.f32.mrf.mxu0  ;;  %v384_v33 = vpop.f32.mrf.mxu1 }
  0xd8   : > { %v295_v34 = vpop.f32.mrf.mxu0  ;;  %v1160_v35 = vpop.f32.mrf.mxu1 }
  0xd9   : > { %v385_v48 = vadd.f32 %v384_v33, %v295_v34 }
  0xda   : > { %v1149_v36 = vpop.f32.mrf.mxu0  ;;  %v389_v37 = vpop.f32.mrf.mxu1 }
  0xdc   : > { %v300_v38 = vpop.f32.mrf.mxu0  ;;  %v1163_v39 = vpop.f32.mrf.mxu1 }
  0xdd   : > { %v390_v57 = vadd.f32 %v389_v37, %v300_v38 }
  0xde   : > { %v1152_v40 = vpop.f32.mrf.mxu0  ;;  %v576_v41 = vpop.f32.mrf.mxu1 }
  0xe0   : > { %v476_v43 = vpop.f32.mrf.mxu0  ;;  %v1179_v44 = vpop.f32.mrf.mxu1 }
  0xe1   : > { %v490_v45 = vadd.f32 %v476_v43, %v380_v42 }
  0xe2   : > { %v1168_v46 = vpop.f32.mrf.mxu0  ;;  %v581_v47 = vpop.f32.mrf.mxu1 }
  0xe3   : > { %v590_v49 = vadd.f32 %v576_v41, %v490_v45  ;;  %v986_v46 = vld [vmem:[%s1481_s3] sm:$0xff] }
  0xe4   : > { %v481_v50 = vpop.f32.mrf.mxu0  ;;  %v1182_v51 = vpop.f32.mrf.mxu1 }
  0xe5   : > { %v491_v54 = vadd.f32 %v481_v50, %v385_v48  ;;  %1193 = vmatmul.mubr.msk.f32.vlgmr.msra.gmra.mxu0 %vm596_vm7, %v590_v49  ;;  %1208 = vmatmul.mubr.msk.f32.vlgmr.msra.gmra.mxu1 %vm596_vm7, %v590_v49 }
  0xe6   : > { %v1171_v55 = vpop.f32.mrf.mxu0  ;;  %v586_v56 = vpop.f32.mrf.mxu1  ;;  %1195 = vmatprep.mubr.msk.f32.mxu0 %vm1266_vm1, %v1265_v1  ;;  %1210 = vmatprep.mubr.msk.f32.mxu1 %vm1266_vm1, %v1265_v1 }
  0xe7   : > { %v591_v58 = vadd.f32 %v581_v47, %v491_v54  ;;  %1217 = vmatpush3.msk.msra.mxu0 %vm606_vm6, %v1087_v52  ;;  %1232 = vmatpush3.msk.msra.mxu1 %vm606_vm6, %v1094_v53  ;;  %v987_v47 = vld [vmem:[%s1481_s3 + $0x8] sm:$0xff] }
  0xe8   : > { %v486_v59 = vpop.f32.mrf.mxu0  ;;  %v1185_v60 = vpop.f32.mrf.mxu1  ;;  %1218 = vmatprep.subr.mxu0 %v1265_v1  ;;  %1233 = vmatprep.subr.mxu1 %v1265_v1 }
  0xe9   : > { %v492_v63 = vadd.f32 %v486_v59, %v390_v57  ;;  %1196 = vmatmul.mubr.msk.f32.gmra.mxu0 %vm596_vm7, %v591_v58  ;;  %1211 = vmatmul.mubr.msk.f32.gmra.mxu1 %vm596_vm7, %v591_v58 }
  0xea   : > { %v1174_v0 = vpop.f32.mrf.mxu0  ;;  %1198 = vmatprep.mubr.msk.f32.mxu0 %vm1266_vm1, %v1265_v1  ;;  %1213 = vmatprep.mubr.msk.f32.mxu1 %vm1266_vm1, %v1265_v1 }
  0xeb   : > { %v592_v2 = vadd.f32 %v586_v56, %v492_v63  ;;  %1219 = vmatpush3.msra.mxu0 %v1086_v61  ;;  %1234 = vmatpush3.msra.mxu1 %v1093_v62 }
  0xec   : > { %1220 = vmatprep.subr.mxu0 %v1265_v1  ;;  %1235 = vmatprep.subr.mxu1 %v1265_v1 }
  0xed   : > { %1199 = vmatmul.mubr.msk.f32.gmra.mxu0 %vm596_vm7, %v592_v2  ;;  %1214 = vmatmul.mubr.msk.f32.gmra.mxu1 %vm596_vm7, %v592_v2 }
  0xee   : > { %1221 = vmatpush3.msra.mxu0 %v1085_v3  ;;  %1222 = vmatprep.mubr.msk.f32.mxu0 %vm1266_vm1, %v1265_v1 }
  0xef   : > { %1236 = vmatpush3.msra.mxu1 %v1092_v4  ;;  %1237 = vmatprep.mubr.msk.f32.mxu1 %vm1266_vm1, %v1265_v1 }
  0xf1   : > { %1223 = vmatmul.mubr.msk.f32.vlgmr.msra.gmra.mxu0 %vm596_vm7, %v590_v49  ;;  %1238 = vmatmul.mubr.msk.f32.vlgmr.msra.gmra.mxu1 %vm596_vm7, %v590_v49 }
  0xf2   : > { %1225 = vmatprep.mubr.msk.f32.mxu0 %vm1266_vm1, %v1265_v1  ;;  %1240 = vmatprep.mubr.msk.f32.mxu1 %vm1266_vm1, %v1265_v1 }
  0xf5   : > { %1226 = vmatmul.mubr.msk.f32.gmra.mxu0 %vm596_vm7, %v591_v58  ;;  %1241 = vmatmul.mubr.msk.f32.gmra.mxu1 %vm596_vm7, %v591_v58 }
  0xf6   : > { %1228 = vmatprep.mubr.msk.f32.mxu0 %vm1266_vm1, %v1265_v1  ;;  %1243 = vmatprep.mubr.msk.f32.mxu1 %vm1266_vm1, %v1265_v1 }
  0xf9   : > { %1229 = vmatmul.mubr.msk.f32.gmra.mxu0 %vm596_vm7, %v592_v2  ;;  %1244 = vmatmul.mubr.msk.f32.gmra.mxu1 %vm596_vm7, %v592_v2 }
 0x1a5   : > { %v676_v5 = vpop.f32.mrf.mxu0  ;;  %v769_v6 = vpop.f32.mrf.mxu1 }
 0x1a6   : > { %690 = vst.msk [vmem:[#allocation2] sm:$0xff] %vm213_vm2, %v676_v5 }
 0x1a7   : > { %v1194_v7 = vpop.f32.mrf.mxu0  ;;  %v1209_v8 = vpop.f32.mrf.mxu1 }
 0x1a9   : > { %v681_v9 = vpop.f32.mrf.mxu0  ;;  %v774_v10 = vpop.f32.mrf.mxu1 }
 0x1aa   : > { %691 = vst.msk [vmem:[#allocation2 + $0x8] sm:$0xff] %vm213_vm2, %v681_v9 }
 0x1ab   : > { %v1197_v11 = vpop.f32.mrf.mxu0  ;;  %v1212_v12 = vpop.f32.mrf.mxu1 }
 0x1ad   : > { %v686_v14 = vpop.f32.mrf.mxu0  ;;  %v779_v15 = vpop.f32.mrf.mxu1 }
 0x1ae   : > { %693 = vst.msk [vmem:[#allocation2 + $0x10] sm:$0x1] %vm692_vm9, %v686_v14  ;;  %v788_v16 = vadd.f32 %v785_v13, %v779_v15 }
 0x1af   : > { %v1200_v1 = vpop.f32.mrf.mxu0  ;;  %v1215_v17 = vpop.f32.mrf.mxu1 }
 0x1b0   : > { %791 = vst.msk [vmem:[#allocation2 + $0x11] sm:$0x1] %vm692_vm9, %v788_v16 }
 0x1b1   : > { %v783_v18 = vld [vmem:[#allocation2 + $0x1] sm:$0xff]  ;;  %v865_v19 = vpop.f32.mrf.mxu0  ;;  %v961_v20 = vpop.f32.mrf.mxu1 }
 0x1b2   : > { %v786_v21 = vadd.f32 %v783_v18, %v769_v6 }
 0x1b3   : > { %v1224_v22 = vpop.f32.mrf.mxu0  ;;  %v1239_v23 = vpop.f32.mrf.mxu1 }
 0x1b4   : > { %789 = vst.msk [vmem:[#allocation2 + $0x1] sm:$0xff] %vm213_vm2, %v786_v21 }
 0x1b5   : > { %v784_v24 = vld [vmem:[#allocation2 + $0x9] sm:$0xff]  ;;  %v870_v25 = vpop.f32.mrf.mxu0  ;;  %v966_v26 = vpop.f32.mrf.mxu1 }
 0x1b6   : > { %v787_v27 = vadd.f32 %v784_v24, %v774_v10 }
 0x1b7   : > { %v1227_v28 = vpop.f32.mrf.mxu0  ;;  %v1242_v29 = vpop.f32.mrf.mxu1 }
 0x1b8   : > { %790 = vst.msk [vmem:[#allocation2 + $0x9] sm:$0xff] %vm213_vm2, %v787_v27 }
 0x1b9   : > { %v875_v32 = vpop.f32.mrf.mxu0  ;;  %v971_v33 = vpop.f32.mrf.mxu1 }
 0x1ba   : > { %v884_v34 = vadd.f32 %v881_v30, %v875_v32  ;;  %v980_v35 = vadd.f32 %v977_v31, %v971_v33 }
 0x1bb   : > { %v1230_v36 = vpop.f32.mrf.mxu0  ;;  %v1245_v37 = vpop.f32.mrf.mxu1 }
 0x1bc   : > { %887 = vst.msk [vmem:[#allocation2 + $0x12] sm:$0x1] %vm692_vm9, %v884_v34  ;;  %983 = vst.msk [vmem:[#allocation2 + $0x13] sm:$0x1] %vm692_vm9, %v980_v35 }
 0x1bf   : > { %v879_v38 = vld [vmem:[#allocation2 + $0x2] sm:$0xff]  ;;  %v880_v39 = vld [vmem:[#allocation2 + $0xa] sm:$0xff] }
 0x1c0   : > { %v882_v40 = vadd.f32 %v879_v38, %v865_v19  ;;  %v883_v41 = vadd.f32 %v880_v39, %v870_v25 }
 0x1c2   : > { %885 = vst.msk [vmem:[#allocation2 + $0x2] sm:$0xff] %vm213_vm2, %v882_v40  ;;  %886 = vst.msk [vmem:[#allocation2 + $0xa] sm:$0xff] %vm213_vm2, %v883_v41 }
 0x1c9   : > { %v975_v42 = vld [vmem:[#allocation2 + $0x3] sm:$0xff]  ;;  %v976_v43 = vld [vmem:[#allocation2 + $0xb] sm:$0xff] }
 0x1ca   : > { %v978_v44 = vadd.f32 %v975_v42, %v961_v20  ;;  %v979_v45 = vadd.f32 %v976_v43, %v966_v26 }
 0x1cc   : > { %981 = vst.msk [vmem:[#allocation2 + $0x3] sm:$0xff] %vm213_vm2, %v978_v44  ;;  %982 = vst.msk [vmem:[#allocation2 + $0xb] sm:$0xff] %vm213_vm2, %v979_v45 }
 0x1d3   : > { %v984_v48 = vld [vmem:[#allocation2 + $0x2] sm:$0xff]  ;;  %v985_v49 = vld [vmem:[#allocation2 + $0xa] sm:$0xff] }
 0x1d4   : > { %v988_v50 = vmul.f32 %v986_v46, %v984_v48  ;;  %v989_v51 = vmul.f32 %v987_v47, %v985_v49 }
 0x1d6   : > { %990 = vst.msk [vmem:[%s197_s10] sm:$0xff] %vm213_vm2, %v988_v50  ;;  %991 = vst.msk [vmem:[%s197_s10 + $0x8] sm:$0xff] %vm213_vm2, %v989_v51 }
 0x1d7 PF: > { %s14_s15 = sadd.s32 1, %s1263_s15  }
 0x1d8   : > { %p11_p4 = scmp.ge.s32.totalorder %s14_s15, 4  }
 0x1da   :  { %13 = sbr.rel (!%p11_p4) target bundleno = 1 (0x1), region = 72 }

</bundles_post_ra>
